<compile_context>
chip_gen: v5e
topology: v5e:2x2
jax: 0.10.0
libtpu: 0.0.40
codegen_flags: <defaults>
</compile_context>

<pallas_src>
import functools
import math

import jax
import jax.numpy as jnp
from jax.experimental import pallas as pl
from jax.experimental.pallas import tpu as pltpu


# ----------------------------------------------------------------------------
# Kernel 1: CustomMappingNetwork  (z -> frequencies_offsets)
# Small per-batch MLP; whole arrays fit in VMEM, single pallas invocation.
# ----------------------------------------------------------------------------
def mapping_kernel(z_ref, w1, b1, w2, b2, w3, b3, w4, b4, out_ref):
    def lrelu(x):
        return jnp.where(x > 0, x, 0.2 * x)

    h = lrelu(jnp.dot(z_ref[...], w1[...], preferred_element_type=jnp.float32) + b1[...])
    h = lrelu(jnp.dot(h, w2[...], preferred_element_type=jnp.float32) + b2[...])
    h = lrelu(jnp.dot(h, w3[...], preferred_element_type=jnp.float32) + b3[...])
    # last layer: bf16 weight (the only big one), f32 accumulate
    out_ref[...] = jnp.dot(h.astype(jnp.bfloat16), w4[...],
                           preferred_element_type=jnp.float32) + b4[...]


def mapping_network(z, p):
    B, Z = z.shape
    MH = p["m_w1"].shape[1]
    MO = p["m_b4"].shape[1]
    w4 = p["m_w4"].astype(jnp.bfloat16)

    flops = 2 * B * (Z * MH + 2 * MH * MH + MH * MO)
    bytes_accessed = (4 * (B * Z + Z * MH + 2 * MH * MH + 3 * MH + MO + B * MO)
                      + 2 * MH * MO)
    return pl.pallas_call(
        mapping_kernel,
        out_shape=jax.ShapeDtypeStruct((B, MO), jnp.float32),
        cost_estimate=pl.CostEstimate(
            flops=int(flops), transcendentals=0, bytes_accessed=int(bytes_accessed)),
    )(z, p["m_w1"], p["m_b1"], p["m_w2"], p["m_b2"],
      p["m_w3"], p["m_b3"], w4, p["m_b4"])


# ----------------------------------------------------------------------------
# Kernel 2: SIREN trunk (8 FiLM layers + fused sigma/color-sine layer + rgb)
# Grid over (batch, point-tiles); weights are VMEM-resident via constant
# index maps; big matmuls run with bf16 operands / f32 accumulation.
# ----------------------------------------------------------------------------
def siren_kernel(coords_ref, rd_ref, freq_ref, ph_ref,
                 w0_ref, wh_ref, wcomb_ref, bfin_ref, wrd_ref, wcl_ref, bcl_ref,
                 out_ref, *, hidden_dim):
    H = hidden_dim

    x = coords_ref[0]                         # (tn, 3) f32 (box-warp folded into w0)
    rd = rd_ref[0]                            # (tn, 3) f32
    fr = freq_ref[0]                          # (9, H)  f32  (already *15 + 30)
    ph = ph_ref[0]                            # (9, H)  f32  (biases pre-folded: fr*b + phase)

    # FiLM layer 0: 3 -> H as three VPU FMAs (skip the MXU for a K=3 contraction)
    w0 = w0_ref[...]                          # (3, H) f32, includes 2/0.24 warp scale
    z0 = (x[:, 0:1] * w0[0:1, :] + x[:, 1:2] * w0[1:2, :] + x[:, 2:3] * w0[2:3, :])
    h = jnp.sin(fr[0:1, :] * z0 + ph[0:1, :])                         # (tn, H) f32

    # FiLM layers 1..7: H -> H, bf16 operands on the MXU, f32 accumulate.
    # FiLM modulation and sin stay in f32 (freqs ~45; bf16 sin arg is too coarse).
    for i in range(7):
        zi = jnp.dot(h.astype(jnp.bfloat16), wh_ref[i],
                     preferred_element_type=jnp.float32)
        h = jnp.sin(fr[i + 1:i + 2, :] * zi + ph[i + 1:i + 2, :])

    # Fused color-sine + sigma matmul: wcomb = [w_cs_x | w_final (lane-padded)],
    # one (tn,H) x (H,H+128) bf16 MXU matmul.
    comb = jnp.dot(h.astype(jnp.bfloat16), wcomb_ref[...],
                   preferred_element_type=jnp.float32)                # (tn, H+128)
    sigma = comb[:, H:H + 1] + bfin_ref[...]                          # (tn, 1)

    # color FiLM: ray-direction part (K=3) as VPU FMAs; bias already in ph row 8.
    wrd = wrd_ref[...]                        # (3, H) f32
    zc = (comb[:, :H]
          + rd[:, 0:1] * wrd[0:1, :] + rd[:, 1:2] * wrd[1:2, :]
          + rd[:, 2:3] * wrd[2:3, :])
    rgb_h = jnp.sin(fr[8:9, :] * zc + ph[8:9, :])

    rgb = jax.nn.sigmoid(
        jnp.dot(rgb_h.astype(jnp.bfloat16), wcl_ref[...],
                preferred_element_type=jnp.float32) + bcl_ref[...])   # (tn, 3)

    # direct slice stores (no concatenate -> no extra VMEM copy)
    out_ref[0, :, 0:3] = rgb
    out_ref[0, :, 3:4] = sigma


def siren_forward(coords, ray_dirs, freqs, ph_eff, p, *, tn):
    """coords/ray_dirs: (B, N, 3) with N % tn == 0; freqs/ph_eff: (B, 9, H)."""
    B, N, _ = coords.shape
    H = p["b0"].shape[1]

    # --- weight prep (once per call, outside the grid) --------------------
    # box-warp scale folded into layer-0 weight (stays f32: runs on the VPU)
    w0s = p["w0"] * (2.0 / 0.24)
    # big MXU operands in bf16 (halves weight DMA/VMEM, MXU-native everywhere)
    w_hid = p["w_hid"].astype(jnp.bfloat16)                           # (7, H, H)
    # fuse sigma head into the color-sine matmul: pad w_final (H,1) to a full
    # 128-lane group and append it as extra output columns of w_cs_x.
    w_comb = jnp.concatenate(
        [p["w_cs_x"], jnp.pad(p["w_final"], ((0, 0), (0, 127)))],
        axis=1).astype(jnp.bfloat16)                                  # (H, H+128)
    w_cl = p["w_cl"].astype(jnp.bfloat16)

    weights = [w0s, w_hid, w_comb, p["b_final"], p["w_cs_rd"], w_cl, p["b_cl"]]

    def full_spec(arr):
        r = arr.ndim
        return pl.BlockSpec(arr.shape, lambda b, n, _r=r: (0,) * _r)

    in_specs = [
        pl.BlockSpec((1, tn, 3), lambda b, n: (b, n, 0)),    # coords
        pl.BlockSpec((1, tn, 3), lambda b, n: (b, n, 0)),    # ray_directions
        pl.BlockSpec((1, 9, H), lambda b, n: (b, 0, 0)),     # frequencies (scaled)
        pl.BlockSpec((1, 9, H), lambda b, n: (b, 0, 0)),     # effective phases
    ] + [full_spec(w) for w in weights]

    out_specs = pl.BlockSpec((1, tn, 4), lambda b, n: (b, n, 0))

    kernel = functools.partial(siren_kernel, hidden_dim=H)
    return pl.pallas_call(
        kernel,
        out_shape=jax.ShapeDtypeStruct((B, N, 4), jnp.float32),
        grid_spec=pltpu.PrefetchScalarGridSpec(
            num_scalar_prefetch=0,
            grid=(B, N // tn),
            in_specs=in_specs,
            out_specs=out_specs,
        ),
        compiler_params=pltpu.CompilerParams(
            dimension_semantics=("parallel", "parallel"),
            vmem_limit_bytes=32 * 1024 * 1024),
    )(coords, ray_dirs, freqs, ph_eff, *weights)


def spatial_siren_forward(coords, z, ray_dirs, params, *, tn=512):
    B, N, _ = coords.shape
    H = params["b0"].shape[1]

    # mapping network -> split; apply freq transform and fold each FiLM layer's
    # linear bias into the phase once per batch:
    #   sin(fr*(Wx + b) + phase) == sin(fr*(Wx) + (fr*b + phase))
    fo = mapping_network(z, params)                 # (B, 18*H)
    half = fo.shape[1] // 2
    freqs = (fo[:, :half] * 15.0 + 30.0).reshape(B, 9, H)
    phases = fo[:, half:].reshape(B, 9, H)
    bias_rows = jnp.concatenate(
        [params["b0"], params["b_hid"], params["b_cs"]], axis=0)      # (9, H)
    ph_eff = freqs * bias_rows[None] + phases                         # (B, 9, H)

    # pad the point axis to a tile multiple; padded rows are dropped afterwards
    n_pad = -(-N // tn) * tn
    if n_pad != N:
        pad = ((0, 0), (0, n_pad - N), (0, 0))
        coords = jnp.pad(coords, pad)
        ray_dirs = jnp.pad(ray_dirs, pad)

    out = siren_forward(coords, ray_dirs, freqs, ph_eff, params, tn=tn)
    return out[:, :N, :] if n_pad != N else out


# ----------------------------------------------------------------------------
# Deterministic parameter init (mirrors the PyTorch init schemes; weights (in,out))
# ----------------------------------------------------------------------------
def _kaiming_leaky(key, fan_in, fan_out, a=0.2):
    kw, kb = jax.random.split(key)
    std = math.sqrt(2.0 / (1.0 + a * a)) / math.sqrt(fan_in)
    w = std * jax.random.normal(kw, (fan_in, fan_out), jnp.float32)
    bound = 1.0 / math.sqrt(fan_in)
    b = jax.random.uniform(kb, (1, fan_out), jnp.float32, -bound, bound)
    return w, b


def _freq_init(key, fan_in, fan_out, freq=25.0):
    kw, kb = jax.random.split(key)
    lim = math.sqrt(6.0 / fan_in) / freq
    w = jax.random.uniform(kw, (fan_in, fan_out), jnp.float32, -lim, lim)
    bound = 1.0 / math.sqrt(fan_in)
    b = jax.random.uniform(kb, (1, fan_out), jnp.float32, -bound, bound)
    return w, b


def _first_layer_init(key, fan_in, fan_out):
    kw, kb = jax.random.split(key)
    lim = 1.0 / fan_in
    w = jax.random.uniform(kw, (fan_in, fan_out), jnp.float32, -lim, lim)
    bound = 1.0 / math.sqrt(fan_in)
    b = jax.random.uniform(kb, (1, fan_out), jnp.float32, -bound, bound)
    return w, b


def init_params(key, z_dim, map_hidden_dim, hidden_dim):
    H = hidden_dim
    map_out = (8 + 1) * H * 2
    keys = iter(jax.random.split(key, 16))
    p = {}
    # mapping network (kaiming leaky-relu init; last weight scaled by 0.25)
    p["m_w1"], p["m_b1"] = _kaiming_leaky(next(keys), z_dim, map_hidden_dim)
    p["m_w2"], p["m_b2"] = _kaiming_leaky(next(keys), map_hidden_dim, map_hidden_dim)
    p["m_w3"], p["m_b3"] = _kaiming_leaky(next(keys), map_hidden_dim, map_hidden_dim)
    w4, b4 = _kaiming_leaky(next(keys), map_hidden_dim, map_out)
    p["m_w4"], p["m_b4"] = w4 * 0.25, b4
    # FiLM layer 0 (first_layer_film_sine_init)
    p["w0"], p["b0"] = _first_layer_init(next(keys), 3, H)
    # FiLM layers 1..7 (frequency_init(25)), stacked
    whs, bhs = [], []
    for _ in range(7):
        w, b = _freq_init(next(keys), H, H)
        whs.append(w)
        bhs.append(b[0])
    p["w_hid"], p["b_hid"] = jnp.stack(whs), jnp.stack(bhs)
    # final sigma layer, stored (H, 1) so it can be packed next to w_cs_x
    wf, bf = _freq_init(next(keys), H, 1)
    p["w_final"], p["b_final"] = wf, bf
    # color FiLM layer on concat([ray_dirs(3), x(H)]) -> split weight rows
    w_cs, b_cs = _freq_init(next(keys), H + 3, H)
    p["w_cs_rd"], p["w_cs_x"], p["b_cs"] = w_cs[:3], w_cs[3:], b_cs
    # color linear layer
    p["w_cl"], p["b_cl"] = _freq_init(next(keys), H, 3)
    return p


if __name__ == "__main__":
    # small shapes (module defaults: H=256, Z=100, MAP_H=256); N not a tile
    # multiple to exercise the padding path.
    B, N, H, Z, MAP_H = 2, 300, 32, 16, 64
    key = jax.random.PRNGKey(0)
    kparam, kc, kz, kr = jax.random.split(key, 4)

    params = init_params(kparam, z_dim=Z, map_hidden_dim=MAP_H, hidden_dim=H)

    coords = jax.random.uniform(kc, (B, N, 3), jnp.float32, minval=-0.12, maxval=0.12)
    z = jax.random.normal(kz, (B, Z), jnp.float32)
    ray_dirs = jax.random.normal(kr, (B, N, 3), jnp.float32)

    out = spatial_siren_forward(coords, z, ray_dirs, params)
    out = jax.block_until_ready(out)
    assert out.shape == (B, N, 4) and out.dtype == jnp.float32
    assert bool(jnp.all(jnp.isfinite(out)))
    print("KERNEL_OK")
</pallas_src>

<mosaic_0001>
module attributes {stable_mosaic.version = 11 : i64} {
  func.func @mapping_kernel(%arg0: memref<2x16xf32, #tpu.memory_space<vmem>>, %arg1: memref<16x64xf32, #tpu.memory_space<vmem>>, %arg2: memref<1x64xf32, #tpu.memory_space<vmem>>, %arg3: memref<64x64xf32, #tpu.memory_space<vmem>>, %arg4: memref<1x64xf32, #tpu.memory_space<vmem>>, %arg5: memref<64x64xf32, #tpu.memory_space<vmem>>, %arg6: memref<1x64xf32, #tpu.memory_space<vmem>>, %arg7: memref<64x576xbf16, #tpu.memory_space<vmem>>, %arg8: memref<1x576xf32, #tpu.memory_space<vmem>>, %arg9: memref<2x576xf32, #tpu.memory_space<vmem>>) attributes {dimension_semantics = [], scalar_prefetch = 0 : i64, scratch_operands = 0 : i64, tpu.core_type = #tpu.core_type<tc>} {
    %c0 = arith.constant 0 : index
    %c0_0 = arith.constant 0 : index
    %0 = vector.load %arg0[%c0, %c0_0] : memref<2x16xf32, #tpu.memory_space<vmem>>, vector<2x16xf32>
    %c0_1 = arith.constant 0 : index
    %c0_2 = arith.constant 0 : index
    %1 = vector.load %arg1[%c0_1, %c0_2] : memref<16x64xf32, #tpu.memory_space<vmem>>, vector<16x64xf32>
    %cst = arith.constant dense<0.000000e+00> : vector<2x64xf32>
    %2 = tpu.matmul %0, %1, %cst {dimension_numbers = #tpu.dot_dimension_numbers<[1], [0], [0], [1], [0, 0, 1, 1], [], []>} : vector<2x16xf32>, vector<16x64xf32>, vector<2x64xf32> -> vector<2x64xf32>
    %c0_3 = arith.constant 0 : index
    %c0_4 = arith.constant 0 : index
    %3 = vector.load %arg2[%c0_3, %c0_4] : memref<1x64xf32, #tpu.memory_space<vmem>>, vector<1x64xf32>
    %4 = vector.broadcast %3 : vector<1x64xf32> to vector<2x64xf32>
    %5 = arith.addf %2, %4 : vector<2x64xf32>
    %cst_5 = arith.constant 0.000000e+00 : f32
    %6 = vector.broadcast %cst_5 : f32 to vector<2x64xf32>
    %7 = arith.cmpf ogt, %5, %6 : vector<2x64xf32>
    %cst_6 = arith.constant 2.000000e-01 : f32
    %8 = vector.broadcast %cst_6 : f32 to vector<2x64xf32>
    %9 = arith.mulf %8, %5 : vector<2x64xf32>
    %10 = arith.select %7, %5, %9 : vector<2x64xi1>, vector<2x64xf32>
    %c0_7 = arith.constant 0 : index
    %c0_8 = arith.constant 0 : index
    %11 = vector.load %arg3[%c0_7, %c0_8] : memref<64x64xf32, #tpu.memory_space<vmem>>, vector<64x64xf32>
    %cst_9 = arith.constant dense<0.000000e+00> : vector<2x64xf32>
    %12 = tpu.matmul %10, %11, %cst_9 {dimension_numbers = #tpu.dot_dimension_numbers<[1], [0], [0], [1], [0, 0, 1, 1], [], []>} : vector<2x64xf32>, vector<64x64xf32>, vector<2x64xf32> -> vector<2x64xf32>
    %c0_10 = arith.constant 0 : index
    %c0_11 = arith.constant 0 : index
    %13 = vector.load %arg4[%c0_10, %c0_11] : memref<1x64xf32, #tpu.memory_space<vmem>>, vector<1x64xf32>
    %14 = vector.broadcast %13 : vector<1x64xf32> to vector<2x64xf32>
    %15 = arith.addf %12, %14 : vector<2x64xf32>
    %cst_12 = arith.constant 0.000000e+00 : f32
    %16 = vector.broadcast %cst_12 : f32 to vector<2x64xf32>
    %17 = arith.cmpf ogt, %15, %16 : vector<2x64xf32>
    %cst_13 = arith.constant 2.000000e-01 : f32
    %18 = vector.broadcast %cst_13 : f32 to vector<2x64xf32>
    %19 = arith.mulf %18, %15 : vector<2x64xf32>
    %20 = arith.select %17, %15, %19 : vector<2x64xi1>, vector<2x64xf32>
    %c0_14 = arith.constant 0 : index
    %c0_15 = arith.constant 0 : index
    %21 = vector.load %arg5[%c0_14, %c0_15] : memref<64x64xf32, #tpu.memory_space<vmem>>, vector<64x64xf32>
    %cst_16 = arith.constant dense<0.000000e+00> : vector<2x64xf32>
    %22 = tpu.matmul %20, %21, %cst_16 {dimension_numbers = #tpu.dot_dimension_numbers<[1], [0], [0], [1], [0, 0, 1, 1], [], []>} : vector<2x64xf32>, vector<64x64xf32>, vector<2x64xf32> -> vector<2x64xf32>
    %c0_17 = arith.constant 0 : index
    %c0_18 = arith.constant 0 : index
    %23 = vector.load %arg6[%c0_17, %c0_18] : memref<1x64xf32, #tpu.memory_space<vmem>>, vector<1x64xf32>
    %24 = vector.broadcast %23 : vector<1x64xf32> to vector<2x64xf32>
    %25 = arith.addf %22, %24 : vector<2x64xf32>
    %cst_19 = arith.constant 0.000000e+00 : f32
    %26 = vector.broadcast %cst_19 : f32 to vector<2x64xf32>
    %27 = arith.cmpf ogt, %25, %26 : vector<2x64xf32>
    %cst_20 = arith.constant 2.000000e-01 : f32
    %28 = vector.broadcast %cst_20 : f32 to vector<2x64xf32>
    %29 = arith.mulf %28, %25 : vector<2x64xf32>
    %30 = arith.select %27, %25, %29 : vector<2x64xi1>, vector<2x64xf32>
    %31 = arith.truncf %30 : vector<2x64xf32> to vector<2x64xbf16>
    %c0_21 = arith.constant 0 : index
    %c0_22 = arith.constant 0 : index
    %32 = vector.load %arg7[%c0_21, %c0_22] : memref<64x576xbf16, #tpu.memory_space<vmem>>, vector<64x576xbf16>
    %cst_23 = arith.constant dense<0.000000e+00> : vector<2x576xf32>
    %33 = tpu.matmul %31, %32, %cst_23 {dimension_numbers = #tpu.dot_dimension_numbers<[1], [0], [0], [1], [0, 0, 1, 1], [], []>} : vector<2x64xbf16>, vector<64x576xbf16>, vector<2x576xf32> -> vector<2x576xf32>
    %c0_24 = arith.constant 0 : index
    %c0_25 = arith.constant 0 : index
    %34 = vector.load %arg8[%c0_24, %c0_25] : memref<1x576xf32, #tpu.memory_space<vmem>>, vector<1x576xf32>
    %35 = vector.broadcast %34 : vector<1x576xf32> to vector<2x576xf32>
    %36 = arith.addf %33, %35 : vector<2x576xf32>
    %c0_26 = arith.constant 0 : index
    %c0_27 = arith.constant 0 : index
    %37 = vector.load %arg9[%c0_26, %c0_27] : memref<2x576xf32, #tpu.memory_space<vmem>>, vector<2x576xf32>
    tpu.vector_store %arg9[%c0_26, %c0_27], %36 {strides = array<i32>} : memref<2x576xf32, #tpu.memory_space<vmem>>, vector<2x576xf32>,
    return
  }
}

</mosaic_0001>

<bundles_post_ra>
// kernel: tpu_custom_call.1
= control target key start
LH: loop header
LB: loop body
LE: loop exit
PB: predicated region body
PF: predicated region fallthrough
CT: control target
= control target key end

     0   :  { %14 = vsyncpa [#allocation3], 0  ;;  %s879_s0 = inlined_call_operand.hbm [shape: f32[2,16], index: 0, kind: input, shape index: {}]   ;;  %s880_s1 = inlined_call_operand.hbm [shape: f32[16,64], index: 1, kind: input, shape index: {}]   ;;  %s881_s2 = inlined_call_operand.vmem [shape: f32[1,64], index: 2, kind: input, shape index: {}]   ;;  %s882_s3 = inlined_call_operand.hbm [shape: f32[64,64], index: 3, kind: input, shape index: {}]   ;;  %s883_s4 = inlined_call_operand.vmem [shape: f32[1,64], index: 4, kind: input, shape index: {}]   ;;  %s884_s5 = inlined_call_operand.hbm [shape: f32[64,64], index: 5, kind: input, shape index: {}]   ;;  %s885_s6 = inlined_call_operand.hbm [shape: f32[1,64], index: 6, kind: input, shape index: {}]   ;;  %s886_s7 = inlined_call_operand.hbm [shape: bf16[64,576], index: 7, kind: input, shape index: {}]   ;;  %s887_s8 = inlined_call_operand.vmem [shape: f32[1,576], index: 8, kind: input, shape index: {}]   ;;  %s888_s9 = inlined_call_operand.hbm [shape: f32[2,576], index: 9, kind: output, shape index: {}]  }
   0x1   :  { %15 = vsyncpa [#allocation6], 0 }
   0x2   :  { %16 = vsyncpa [#allocation9], 0 }
   0x3   :  { %17 = vsyncpa [#allocation12], 0  ;;  %s34_s11 = sshll.u32 %s880_s1, 4  ;;  %s35_s11 = int_to_ptr.hbm [resolvable:$true] %s34_s11 }
   0x4   :  { %18 = vsyncpa [#allocation4], 0  ;;  %s781_s12 = smov [#allocation5]   ;;  %s64_s16 = sshll.u32 %s884_s5, 4  ;;  %s65_s16 = int_to_ptr.hbm [resolvable:$true] %s64_s16 }
   0x5   :  { %s36_s13 = sshll.u32 %s781_s12, 4  ;;  %s782_s17 = smov 128   ;;  %s37_s13 = int_to_ptr.vmem [resolvable:$true] %s36_s13 }
   0x6   :  { %s783_s18 = smov 8   ;;  %s784_s19 = smov [#allocation8]  }
   0x7   :  { %42 = dma.hbm_to_vmem [thread:$0]  %s35_s11, 256, %s37_s13, [#allocation6], %s782_s17, %s782_s17, %s783_s18  }
   0x8   :  { %s66_s20 = sshll.u32 %s784_s19, 4  ;;  %s24_s23 = sshll.u32 %s879_s0, 4  ;;  %s67_s20 = int_to_ptr.vmem [resolvable:$true] %s66_s20  ;;  %s25_s23 = int_to_ptr.hbm [resolvable:$true] %s24_s23 }
   0x9   :  { %72 = dma.hbm_to_vmem [thread:$0]  %s65_s16, 1024, %s67_s20, [#allocation9], %s782_s17, %s782_s17, %s783_s18  }
   0xa   :  { %s49_s25 = sshll.u32 %s882_s3, 4  ;;  %s785_s26 = smov [#allocation2]   ;;  %s50_s25 = int_to_ptr.hbm [resolvable:$true] %s49_s25 }
   0xb   :  { %s26_s27 = sshll.u32 %s785_s26, 4  ;;  %s786_s5 = smov [#allocation7]   ;;  %s27_s27 = int_to_ptr.vmem [resolvable:$true] %s26_s27 }
   0xc   :  { %29 = dma.hbm_to_vmem [thread:$0]  %s25_s23, 32, %s27_s27, [#allocation3]  }
   0xd   :  { %s51_s28 = sshll.u32 %s786_s5, 4  ;;  %s78_s10 = sshll.u32 %s885_s6, 4  ;;  %s52_s28 = int_to_ptr.vmem [resolvable:$true] %s51_s28  ;;  %s79_s10 = int_to_ptr.hbm [resolvable:$true] %s78_s10 }
   0xe   :  { %57 = dma.hbm_to_vmem [thread:$0]  %s50_s25, 1024, %s52_s28, [#allocation6], %s782_s17, %s782_s17, %s783_s18  }
   0xf   :  { %s88_s12 = sshll.u32 %s886_s7, 4  ;;  %s787_s13 = smov [#allocation10]   ;;  %s89_s12 = int_to_ptr.hbm [resolvable:$true] %s88_s12 }
  0x10   :  { %s80_s3 = sshll.u32 %s787_s13, 4  ;;  %s788_s14 = smov [#allocation11]   ;;  %s81_s3 = int_to_ptr.vmem [resolvable:$true] %s80_s3 }
  0x11   :  { %83 = dma.hbm_to_vmem [thread:$0]  %s79_s10, 16, %s81_s3, [#allocation9]  }
  0x12   :  { %s90_s15 = sshll.u32 %s788_s14, 4  ;;  %s789_s16 = smov 320   ;;  %s91_s15 = int_to_ptr.vmem [resolvable:$true] %s90_s15 }
  0x13   :  { %s790_s19 = smov 20  }
  0x14   :  { %96 = dma.hbm_to_vmem [thread:$0]  %s89_s12, 2560, %s91_s15, [#allocation12], %s789_s16, %s789_s16, %s790_s19  }
  0x15   :  { %771 = dma.done.wait [#allocation3], 32  }
  0x16   :  { %772 = vsyncadd [#allocation3], 4294967264 }
  0x17   :  { %773 = dma.done.wait [#allocation6], 1280  }
  0x18   :  { %774 = vsyncadd [#allocation6], 4294966016 }
  0x19   :  { %775 = dma.done.wait [#allocation9], 1040  }
  0x1a   :  { %776 = vsyncadd [#allocation9], 4294966256 }
  0x1b   :  { %777 = dma.done.wait [#allocation12], 2560  }
  0x1c   :  { %778 = vsyncadd [#allocation12], 4294964736  ;;  %v126_v0 = vld [vmem:[#allocation5 + $0x8] sm:$0xff]  ;;  %v125_v1 = vld [vmem:[#allocation5] sm:$0xff]  ;;  %vm131_vm0 = vcmask 130048   ;;  %vm170_vm2 = vcmask 523264  }
  0x1d   :  { %149 = vmatpush.msra.mxu0 %v126_v0  ;;  %v124_v2 = vld [vmem:[#allocation2] sm:$0x3]  ;;  %v165_v3 = vld [vmem:[#allocation7 + $0x38] sm:$0xff]  ;;  %v164_v4 = vld [vmem:[#allocation7 + $0x30] sm:$0xff]  ;;  %vm451_vm5 = vcmask 1041408   ;;  %vm453_vm6 = vcmask 1045508  }
  0x1e   :  { %182 = vmatpush.msra.mxu1 %v165_v3  ;;  %v163_v5 = vld [vmem:[#allocation7 + $0x28] sm:$0xff]  ;;  %v162_v6 = vld [vmem:[#allocation7 + $0x20] sm:$0xff]  ;;  %v161_v7 = vld [vmem:[#allocation7 + $0x18] sm:$0xff]  ;;  %vm455_vm7 = vcmask 1043456   ;;  %s468_s23 = sshll.u32 %s888_s9, 4  ;;  %vm459_vm8 = vcmask 517120   ;;  %s469_s23 = int_to_ptr.hbm [resolvable:$true] %s468_s23 }
  0x1f   :  { %150 = vmatpush.msra.mxu0 %v125_v1  ;;  %v160_v8 = vld [vmem:[#allocation7 + $0x10] sm:$0xff]  ;;  %v159_v9 = vld [vmem:[#allocation7 + $0x8] sm:$0xff]  ;;  %v158_v10 = vld [vmem:[#allocation7] sm:$0xff] }
  0x20   :  { %481 = vmatmul.msk.f32.vlgmr.msra.gmra.mxu0 %vm131_vm0, %v124_v2  ;;  %183 = vmatpush.msra.mxu1 %v164_v4  ;;  %v204_v11 = vld [vmem:[#allocation8 + $0x38] sm:$0xff]  ;;  %v203_v12 = vld [vmem:[#allocation8 + $0x30] sm:$0xff]  ;;  %v202_v13 = vld [vmem:[#allocation8 + $0x28] sm:$0xff] }
  0x21   :  { %220 = vmatpush.msra.mxu2 %v204_v11  ;;  %v201_v14 = vld [vmem:[#allocation8 + $0x20] sm:$0xff]  ;;  %v200_v15 = vld [vmem:[#allocation8 + $0x18] sm:$0xff]  ;;  %v600_v16 = vld [vmem:[%s881_s2] ss:$0 sm:$0xff] }
  0x22   :  { %184 = vmatpush.msra.mxu1 %v163_v5  ;;  %v199_v21 = vld [vmem:[#allocation8 + $0x10] sm:$0xff]  ;;  %v198_v22 = vld [vmem:[#allocation8 + $0x8] sm:$0xff]  ;;  %v197_v23 = vld [vmem:[#allocation8] sm:$0xff] }
  0x23   :  { %221 = vmatpush.msra.mxu2 %v203_v12  ;;  %v546_v24 = vld [vmem:[#allocation11 + $0x78] sm:$0xf]  ;;  %v586_v25 = vld [vmem:[#allocation11 + $0x88] sm:$0xf0]  ;;  %v584_v26 = vld [vmem:[#allocation11 + $0x7c] sm:$0xf] }
  0x24   :  { %185 = vmatpush.msra.mxu1 %v162_v6  ;;  %v547_v27 = vor.u32 %v586_v25, %v546_v24  ;;  %v548_v28 = vld [vmem:[#allocation11 + $0x8c] sm:$0xf0]  ;;  %v554_v29 = vld [vmem:[#allocation11 + $0x80] sm:$0xf]  ;;  %v587_v30 = vld [vmem:[#allocation11 + $0x90] sm:$0xf0] }
  0x25   :  { %222 = vmatpush.msra.mxu2 %v202_v13  ;;  %v551_v31 = vor.u32 %v584_v26, %v548_v28  ;;  %v555_v32 = vor.u32 %v587_v30, %v554_v29  ;;  %v585_v33 = vld [vmem:[#allocation11 + $0x84] sm:$0xf]  ;;  %v556_v34 = vld [vmem:[#allocation11 + $0x94] sm:$0xf0]  ;;  %v526_v35 = vld [vmem:[#allocation11 + $0x50] sm:$0xf] }
  0x26   :  { %186 = vmatpush.msra.mxu1 %v161_v7  ;;  %383 = vmatpush.bf16.msra.mxu3 %v547_v27  ;;  %v559_v36 = vor.u32 %v585_v33, %v556_v34  ;;  %v581_v37 = vld [vmem:[#allocation11 + $0x60] sm:$0xf0]  ;;  %v579_v38 = vld [vmem:[#allocation11 + $0x54] sm:$0xf]  ;;  %v528_v39 = vld [vmem:[#allocation11 + $0x64] sm:$0xf0] }
  0x27   :  { %223 = vmatpush.msra.mxu2 %v201_v14  ;;  %396 = vmatpush.bf16.msrb.mxu0 %v551_v31  ;;  %v527_v40 = vor.u32 %v581_v37, %v526_v35  ;;  %v531_v41 = vor.u32 %v579_v38, %v528_v39  ;;  %v534_v42 = vld [vmem:[#allocation11 + $0x58] sm:$0xf]  ;;  %v582_v43 = vld [vmem:[#allocation11 + $0x68] sm:$0xf0]  ;;  %v580_v44 = vld [vmem:[#allocation11 + $0x5c] sm:$0xf] }
  0x28   :  { %187 = vmatpush.msra.mxu1 %v160_v8  ;;  %v535_v45 = vor.u32 %v582_v43, %v534_v42  ;;  %v536_v46 = vld [vmem:[#allocation11 + $0x6c] sm:$0xf0]  ;;  %v601_v48 = vld [vmem:[%s883_s4] ss:$0 sm:$0xff]  ;;  %v506_v53 = vld [vmem:[#allocation11 + $0x28] sm:$0xf] }
  0x29   :  { %224 = vmatpush.msra.mxu2 %v200_v15  ;;  %v539_v47 = vor.u32 %v580_v44, %v536_v46  ;;  %v576_v54 = vld [vmem:[#allocation11 + $0x38] sm:$0xf0]  ;;  %v574_v55 = vld [vmem:[#allocation11 + $0x2c] sm:$0xf]  ;;  %v508_v57 = vld [vmem:[#allocation11 + $0x3c] sm:$0xf0] }
  0x2a   :  { %188 = vmatpush.msra.mxu1 %v159_v9  ;;  %384 = vmatpush.bf16.msra.mxu3 %v527_v40  ;;  %v507_v56 = vor.u32 %v576_v54, %v506_v53  ;;  %v514_v58 = vld [vmem:[#allocation11 + $0x30] sm:$0xf]  ;;  %v577_v59 = vld [vmem:[#allocation11 + $0x40] sm:$0xf0]  ;;  %v511_v60 = vor.u32 %v574_v55, %v508_v57  ;;  %v575_v62 = vld [vmem:[#allocation11 + $0x34] sm:$0xf] }
  0x2b   :  { %225 = vmatpush.msra.mxu2 %v199_v21  ;;  %397 = vmatpush.bf16.msrb.mxu0 %v531_v41  ;;  %v515_v61 = vor.u32 %v577_v59, %v514_v58  ;;  %v516_v63 = vld [vmem:[#allocation11 + $0x44] sm:$0xf0]  ;;  %v486_v1 = vld [vmem:[#allocation11] sm:$0xf]  ;;  %v571_v2 = vld [vmem:[#allocation11 + $0x10] sm:$0xf0] }
  0x2c   :  { %189 = vmatpush.msra.mxu1 %v158_v10  ;;  %v519_v0 = vor.u32 %v575_v62, %v516_v63  ;;  %v569_v3 = vld [vmem:[#allocation11 + $0x4] sm:$0xf]  ;;  %v487_v4 = vor.u32 %v571_v2, %v486_v1  ;;  %v488_v5 = vld [vmem:[#allocation11 + $0x14] sm:$0xf0]  ;;  %v494_v6 = vld [vmem:[#allocation11 + $0x8] sm:$0xf] }
  0x2d   :  { %226 = vmatpush.msra.mxu2 %v198_v22  ;;  %v572_v7 = vld [vmem:[#allocation11 + $0x18] sm:$0xf0]  ;;  %v491_v8 = vor.u32 %v569_v3, %v488_v5  ;;  %v570_v10 = vld [vmem:[#allocation11 + $0xc] sm:$0xf]  ;;  %v496_v11 = vld [vmem:[#allocation11 + $0x1c] sm:$0xf0] }
  0x2e   :  { %409 = vmatpush.bf16.msrb.mxu1 %v555_v32  ;;  %385 = vmatpush.bf16.msra.mxu3 %v507_v56  ;;  %v495_v9 = vor.u32 %v572_v7, %v494_v6  ;;  %v499_v12 = vor.u32 %v570_v10, %v496_v11  ;;  %v562_v13 = vld [vmem:[#allocation11 + $0x88] sm:$0xf]  ;;  %v588_v14 = vld [vmem:[#allocation11 + $0x98] sm:$0xf0]  ;;  %v502_v22 = vld [vmem:[#allocation11 + $0x10] sm:$0xf] }
  0x2f   :  { %227 = vmatpush.msra.mxu2 %v197_v23  ;;  %398 = vmatpush.bf16.msrb.mxu0 %v511_v60  ;;  %v563_v15 = vor.u32 %v588_v14, %v562_v13  ;;  %v573_v23 = vld [vmem:[#allocation11 + $0x20] sm:$0xf0]  ;;  %v602_v25 = vld [vmem:[#allocation10] ss:$0 sm:$0xff]  ;;  %v260_v31 = vld [vmem:[%s887_s8] sm:$0x1f] }
  0x30   :  { %v503_v24 = vor.u32 %v573_v23, %v502_v22  ;;  %v263_v34 = vperm.slane %v260_v31, 1  ;;  %v264_v35 = vperm.slane %v260_v31, 2  ;;  %v265_v37 = vperm.slane %v260_v31, 3  ;;  %s791_s8 = smov [#allocation13]  }
  0x31   :  { %422 = vmatpush.bf16.msrb.mxu2 %v559_v36  ;;  %v262_v36 = vperm.slane %v260_v31, 0  ;;  %v266_v54 = vperm.slane %v260_v31, 4  ;;  %s466_s20 = sshll.u32 %s791_s8, 4  ;;  %s467_s20 = int_to_ptr.vmem [resolvable:$true] %s466_s20 }
  0x32   :  { %410 = vmatpush.bf16.msrb.mxu1 %v535_v45  ;;  %386 = vmatpush.bf16.msra.mxu3 %v487_v4 }
  0x33   :  { %399 = vmatpush.bf16.msrb.mxu0 %v491_v8 }
  0x35   :  { %423 = vmatpush.bf16.msrb.mxu2 %v539_v47 }
  0x36   :  { %411 = vmatpush.bf16.msrb.mxu1 %v515_v61  ;;  %435 = vmatpush.bf16.msrb.mxu3 %v563_v15 }
  0x39   :  { %424 = vmatpush.bf16.msrb.mxu2 %v519_v0 }
  0x3a   :  { %412 = vmatpush.bf16.msrb.mxu1 %v495_v9 }
  0x3d   :  { %425 = vmatpush.bf16.msrb.mxu2 %v499_v12 }
  0x9d   :  { %v152_v17 = vpop.f32.mrf.mxu0 }
  0x9e   :  { %v153_v18 = vadd.f32 %v600_v16, %v152_v17  ;;  %v542_v16 = vld [vmem:[#allocation11 + $0x60] sm:$0xf]  ;;  %v583_v17 = vld [vmem:[#allocation11 + $0x70] sm:$0xf0] }
  0xa0   :  { %v156_v19 = vmul.f32 0.2, %v153_v18  ;;  %vm155_vm1 = vcmp.gt.f32.partialorder %v153_v18, 0.0 }
  0xa2   :  { %v157_v20 = vsel %vm155_vm1, %v153_v18, %v156_v19  ;;  %v543_v18 = vor.u32 %v583_v17, %v542_v16  ;;  %v522_v19 = vld [vmem:[#allocation11 + $0x38] sm:$0xf] }
  0xa3   :  { %482 = vmatmul.msk.f32.vlgmr.msra.gmra.mxu1 %vm170_vm2, %v157_v20  ;;  %v578_v20 = vld [vmem:[#allocation11 + $0x48] sm:$0xf0] }
  0xa4   :  { %436 = vmatpush.bf16.msrb.mxu3 %v543_v18  ;;  %v523_v21 = vor.u32 %v578_v20, %v522_v19 }
  0xa8   :  { %437 = vmatpush.bf16.msrb.mxu3 %v523_v21 }
  0xac   :  { %438 = vmatpush.bf16.msrb.mxu3 %v503_v24 }
 0x120   :  { %v191_v49 = vpop.f32.mrf.mxu1 }
 0x121   :  { %v192_v50 = vadd.f32 %v601_v48, %v191_v49 }
 0x123   :  { %v195_v51 = vmul.f32 0.2, %v192_v50  ;;  %vm194_vm3 = vcmp.gt.f32.partialorder %v192_v50, 0.0 }
 0x125   :  { %v196_v52 = vsel %vm194_vm3, %v192_v50, %v195_v51 }
 0x126   :  { %483 = vmatmul.msk.f32.vlgmr.msra.gmra.mxu2 %vm170_vm2, %v196_v52 }
 0x1a9   :  { %v229_v26 = vpop.f32.mrf.mxu2 }
 0x1aa   :  { %v230_v27 = vadd.f32 %v602_v25, %v229_v26 }
 0x1ac   :  { %vm232_vm4 = vcmp.gt.f32.partialorder %v230_v27, 0.0  ;;  %v233_v28 = vmul.f32 0.2, %v230_v27 }
 0x1ae   :  { %v234_v29 = vsel %vm232_vm4, %v230_v27, %v233_v28 }
 0x1af   :  { %v235_v30 = vpack.c.bf16 %v234_v29, %v234_v29 }
 0x1b1   :  { %564 = vmatmul.msk.bf16.vlgmr.msra.gmra.mxu3 %vm170_vm2, %v235_v30  ;;  %565 = vmatmul.msk.bf16.vlgmr.msrb.gmra.mxu0 %vm170_vm2, %v235_v30 }
 0x1b2   :  { %566 = vmatmul.msk.bf16.vlgmr.msrb.gmra.mxu1 %vm170_vm2, %v235_v30  ;;  %567 = vmatmul.msk.bf16.vlgmr.msrb.gmra.mxu2 %vm170_vm2, %v235_v30 }
 0x1c1   :  { %568 = vmatmul.msk.bf16.vlgmr.msrb.gmra.mxu3 %vm170_vm2, %v235_v30 }
 0x22e   :  { %v401_v32 = vpop.f32.mrf.mxu0 }
 0x22f   :  { %v414_v33 = vpop.f32.mrf.mxu1  ;;  %v402_v38 = vadd.f32 %v401_v32, %v263_v34 }
 0x230   :  { %v415_v39 = vadd.f32 %v414_v33, %v264_v35 }
 0x231   :  { %v448_v46 = vrot.slane %v402_v38, 6 }
 0x232   :  { %v449_v47 = vrot.slane %v415_v39, 4 }
 0x234   :  { %v388_v40 = vpop.f32.mrf.mxu3 }
 0x235   :  { %v427_v41 = vpop.f32.mrf.mxu2  ;;  %v389_v42 = vadd.f32 %v388_v40, %v262_v36 }
 0x236   :  { %v428_v43 = vadd.f32 %v427_v41, %v265_v37  ;;  %v403_v44 = vpop.f32.mrf.mxu0 }
 0x237   :  { %v416_v45 = vpop.f32.mrf.mxu1  ;;  %v452_v49 = vsel %vm451_vm5, %v389_v42, %v448_v46 }
 0x238   :  { %v450_v48 = vrot.slane %v428_v43, 2 }
 0x23a   :  { %v454_v50 = vsel %vm453_vm6, %v449_v47, %v450_v48 }
 0x23b   :  { %v456_v51 = vsel %vm455_vm7, %v452_v49, %v454_v50 }
 0x23c   :  { %v390_v52 = vpop.f32.mrf.mxu3  ;;  %458 = vst [vmem:[#allocation13] sm:$0xff] %v456_v51 }
 0x23d   :  { %v429_v53 = vpop.f32.mrf.mxu2 }
 0x244   :  { %v440_v55 = vpop.f32.mrf.mxu3 }
 0x245   :  { %v441_v56 = vadd.f32 %v440_v55, %v266_v54 }
 0x247   :  { %460 = vst.msk [vmem:[#allocation13 + $0x8] sm:$0x3] %vm459_vm8, %v441_v56 }
 0x248   :  { %471 = dma.vmem_to_hbm [thread:$0]  %s467_s20, 160, %s469_s23, [#allocation4]  }
 0x24c   :  { %v442_v57 = vpop.f32.mrf.mxu3 }
 0x24d   :  { %779 = dma.done.wait [#allocation4], 160  }
 0x24e   :  { %780 = vsyncadd [#allocation4], 4294967136 }
 0x24f   :  { %476 = vsyncpa [#allocation3], 1 }
 0x250   :  { %477 = vsyncpa [#allocation6], 1 }
 0x251   :  { %478 = vsyncpa [#allocation9], 1 }
 0x252   :  { %479 = vsyncpa [#allocation12], 1 }
 0x253   :  { %480 = vsyncpa [#allocation4], 1 }

</bundles_post_ra>
